<compile_context>
chip_gen: v5e
topology: v5e:2x2
jax: 0.10.0
libtpu: 0.0.40
codegen_flags: <defaults>
</compile_context>

<pallas_src>
import functools

import jax
import jax.numpy as jnp
from jax import lax
from jax.experimental import pallas as pl
from jax.experimental.pallas import tpu as pltpu


def _round_up(x, m):
    return ((x + m - 1) // m) * m


def _contrastive_kernel(x_ref, trow_ref, tcol_ref, out_ref, g_acc, *,
                        margin, inv_hw, num_pairs):
    k = pl.program_id(0)

    @pl.when(k == 0)
    def _():
        g_acc[...] = jnp.zeros_like(g_acc)

    # Streamed Gram accumulation: g += x_k @ x_k^T (contract feature dim of
    # both operands; no transposed tile materialized).
    x = x_ref[...]                                   # (B, TK)
    g_acc[...] += lax.dot_general(
        x, x,
        dimension_numbers=(((1,), (1,)), ((), ())),
        preferred_element_type=jnp.float32)

    @pl.when(k == pl.num_programs(0) - 1)
    def _():
        g = g_acc[...]                               # (B, B) f32
        B = g.shape[0]
        row_idx = lax.broadcasted_iota(jnp.int32, (B, B), 0)
        col_idx = lax.broadcasted_iota(jnp.int32, (B, B), 1)

        # Squared norms from the Gram diagonal (symmetric, so reduce either axis).
        diag = row_idx == col_idx
        gd = jnp.where(diag, g, jnp.float32(0.0))
        sq_col = jnp.sum(gd, axis=1, keepdims=True)  # (B, 1): g[i, i]
        sq_row = jnp.sum(gd, axis=0, keepdims=True)  # (1, B): g[j, j]

        # mean((x_i - x_j)^2) summed over the 3 fields == (|xi|^2+|xj|^2-2 xi.xj)/HW
        d = (sq_col + sq_row - 2.0 * g) * jnp.float32(inv_hw)
        d = jnp.maximum(d, 0.0)                      # guard cancellation negatives

        labels_equal = tcol_ref[...] == trow_ref[...]   # int32 compare -> (B, B)
        per_pair = jnp.where(labels_equal, d,
                             jnp.maximum(jnp.float32(margin) - d, 0.0))
        upper = col_idx > row_idx                    # strict upper triangle (i < j)
        total = jnp.sum(jnp.where(upper, per_pair, jnp.float32(0.0)))
        out_ref[0, 0] = total * jnp.float32(1.0 / num_pairs)


def structural_contrastive_loss(entropy, alignment, curvature, targets,
                                margin=1.0, temperature=0.1,
                                block_features=512):
    """Pallas implementation of StructuralContrastiveLoss.forward.

    entropy/alignment/curvature: [B, H, W] float arrays.
    targets: [B] integer class labels.
    Returns scalar f32 loss. (temperature is unused by the reference forward.)
    """
    B, H, W = entropy.shape
    if B < 2:
        # Reference returns 0.0 when there are no pairs.
        return jnp.float32(0.0)

    hw = H * W
    feat = 3 * hw

    def prep(x):
        x = x.reshape(B, hw)
        # Keep bf16 inputs as bf16 (f32 MXU accumulation below); upcast others.
        if x.dtype not in (jnp.bfloat16, jnp.float32):
            x = x.astype(jnp.float32)
        return x

    x_cat = jnp.concatenate([prep(entropy), prep(alignment), prep(curvature)],
                            axis=1)                                  # (B, 3*HW)

    # Feature-axis tiling: TK multiple of 128, feature dim zero-padded to a
    # multiple of TK (zeros are exact no-ops for the Gram / diagonal).
    tk = min(int(block_features), _round_up(feat, 128))
    f_pad = _round_up(feat, tk)
    if f_pad != feat:
        x_cat = jnp.pad(x_cat, ((0, 0), (0, f_pad - feat)))
    num_k = f_pad // tk

    t = targets.astype(jnp.int32)
    trow = t.reshape(1, B)
    tcol = t.reshape(B, 1)

    num_pairs = B * (B - 1) // 2
    kernel = functools.partial(_contrastive_kernel,
                               margin=float(margin),
                               inv_hw=1.0 / hw,
                               num_pairs=num_pairs)

    itemsize = jnp.dtype(x_cat.dtype).itemsize
    cost = pl.CostEstimate(flops=2 * B * B * f_pad,
                           transcendentals=0,
                           bytes_accessed=B * f_pad * itemsize + 2 * B * 4 + 4)

    out = pl.pallas_call(
        kernel,
        out_shape=jax.ShapeDtypeStruct((1, 1), jnp.float32),
        grid_spec=pltpu.PrefetchScalarGridSpec(
            num_scalar_prefetch=0,
            grid=(num_k,),
            in_specs=[
                pl.BlockSpec((B, tk), lambda k: (0, k)),   # streamed features
                pl.BlockSpec((1, B), lambda k: (0, 0)),    # targets (row)
                pl.BlockSpec((B, 1), lambda k: (0, 0)),    # targets (col)
            ],
            out_specs=pl.BlockSpec((1, 1), lambda k: (0, 0),
                                   memory_space=pltpu.MemorySpace.SMEM),
            scratch_shapes=[pltpu.VMEM((B, B), jnp.float32)],  # Gram accumulator
        ),
        compiler_params=pltpu.CompilerParams(
            dimension_semantics=("arbitrary",),
            vmem_limit_bytes=32 * 1024 * 1024),
        cost_estimate=cost,
    )(x_cat, trow, tcol)
    return out[0, 0]


def _reference_loss(entropy, alignment, curvature, targets, margin=1.0):
    """Pure-JAX replica of the PyTorch double loop, for verification."""
    B = targets.shape[0]
    total = 0.0
    num_pairs = 0
    for i in range(B):
        for j in range(i + 1, B):
            d = (jnp.mean((entropy[i] - entropy[j]) ** 2)
                 + jnp.mean((alignment[i] - alignment[j]) ** 2)
                 + jnp.mean((curvature[i] - curvature[j]) ** 2))
            if bool(targets[i] == targets[j]):
                total = total + d
            else:
                total = total + jnp.maximum(margin - d, 0.0)
            num_pairs += 1
    return total / num_pairs


if __name__ == "__main__":
    B, H, W = 8, 16, 16
    key = jax.random.PRNGKey(0)
    k_e, k_a, k_c, k_t = jax.random.split(key, 4)

    entropy = jax.random.normal(k_e, (B, H, W), dtype=jnp.float32)
    alignment = jax.random.normal(k_a, (B, H, W), dtype=jnp.float32)
    curvature = jax.random.normal(k_c, (B, H, W), dtype=jnp.float32)
    targets = jax.random.randint(k_t, (B,), 0, 3)

    loss = structural_contrastive_loss(entropy, alignment, curvature, targets,
                                       margin=1.0, temperature=0.1)
    loss = jax.block_until_ready(loss)

    ref = _reference_loss(entropy, alignment, curvature, targets, margin=1.0)
    assert jnp.allclose(loss, ref, rtol=1e-4, atol=1e-5), (loss, ref)

    print("KERNEL_OK")
</pallas_src>

<mosaic_0001>
module attributes {stable_mosaic.version = 11 : i64} {
  func.func @_contrastive_kernel(%arg0: i32, %arg1: memref<8x512xf32, #tpu.memory_space<vmem>>, %arg2: memref<1x8xi32, #tpu.memory_space<vmem>>, %arg3: memref<8x1xi32, #tpu.memory_space<vmem>>, %arg4: memref<1x1xf32, #tpu.memory_space<smem>>, %arg5: memref<8x8xf32, #tpu.memory_space<vmem>>) attributes {dimension_semantics = [#tpu.dimension_semantics<arbitrary>], iteration_bounds = array<i64: 2>, scalar_prefetch = 0 : i64, scratch_operands = 1 : i64, tpu.core_type = #tpu.core_type<tc>, window_params = [{transform_indices = @transform_0, window_bounds = array<i64: 8, 512>}, {pipeline_mode = #tpu.pipeline_mode<synchronous>, transform_indices = @transform_1, window_bounds = array<i64: 1, 8>}, {pipeline_mode = #tpu.pipeline_mode<synchronous>, transform_indices = @transform_2, window_bounds = array<i64: 8, 1>}, {transform_indices = @transform_3, window_bounds = array<i64: 1, 1>}]} {
    %c0_i32 = arith.constant 0 : i32
    %0 = arith.cmpi eq, %arg0, %c0_i32 : i32
    %1 = arith.extui %0 : i1 to i32
    %c0_i32_0 = arith.constant 0 : i32
    %2 = arith.cmpi ne, %1, %c0_i32_0 : i32
    scf.if %2 {
      %cst_7 = arith.constant 0.000000e+00 : f32
      %11 = vector.broadcast %cst_7 : f32 to vector<8x8xf32>
      %c0_8 = arith.constant 0 : index
      %c0_9 = arith.constant 0 : index
      %12 = vector.load %arg5[%c0_8, %c0_9] : memref<8x8xf32, #tpu.memory_space<vmem>>, vector<8x8xf32>
      tpu.vector_store %arg5[%c0_8, %c0_9], %11 {strides = array<i32>} : memref<8x8xf32, #tpu.memory_space<vmem>>, vector<8x8xf32>,
    } else {
    }
    %c0 = arith.constant 0 : index
    %c0_1 = arith.constant 0 : index
    %3 = vector.load %arg1[%c0, %c0_1] : memref<8x512xf32, #tpu.memory_space<vmem>>, vector<8x512xf32>
    %c0_2 = arith.constant 0 : index
    %c0_3 = arith.constant 0 : index
    %4 = vector.load %arg5[%c0_2, %c0_3] : memref<8x8xf32, #tpu.memory_space<vmem>>, vector<8x8xf32>
    %cst = arith.constant dense<0.000000e+00> : vector<8x8xf32>
    %5 = tpu.matmul %3, %3, %cst {dimension_numbers = #tpu.dot_dimension_numbers<[1], [1], [0], [0], [0, 0, 1, 0], [], []>} : vector<8x512xf32>, vector<8x512xf32>, vector<8x8xf32> -> vector<8x8xf32>
    %6 = arith.addf %4, %5 : vector<8x8xf32>
    %c0_4 = arith.constant 0 : index
    %c0_5 = arith.constant 0 : index
    %7 = vector.load %arg5[%c0_4, %c0_5] : memref<8x8xf32, #tpu.memory_space<vmem>>, vector<8x8xf32>
    tpu.vector_store %arg5[%c0_4, %c0_5], %6 {strides = array<i32>} : memref<8x8xf32, #tpu.memory_space<vmem>>, vector<8x8xf32>,
    %c1_i32 = arith.constant 1 : i32
    %8 = arith.cmpi eq, %arg0, %c1_i32 : i32
    %9 = arith.extui %8 : i1 to i32
    %c0_i32_6 = arith.constant 0 : i32
    %10 = arith.cmpi ne, %9, %c0_i32_6 : i32
    scf.if %10 {
      %c0_7 = arith.constant 0 : index
      %c0_8 = arith.constant 0 : index
      %11 = vector.load %arg5[%c0_7, %c0_8] : memref<8x8xf32, #tpu.memory_space<vmem>>, vector<8x8xf32>
      %12 = tpu.iota {dimensions = array<i32: 0>} : vector<8x8xi32>
      %13 = tpu.iota {dimensions = array<i32: 1>} : vector<8x8xi32>
      %14 = arith.cmpi eq, %12, %13 : vector<8x8xi32>
      %cst_9 = arith.constant 0.000000e+00 : f32
      %15 = vector.broadcast %cst_9 : f32 to vector<8x8xf32>
      %16 = arith.select %14, %11, %15 : vector<8x8xi1>, vector<8x8xf32>
      %cst_10 = arith.constant dense<0.000000e+00> : vector<8xf32>
      %17 = vector.multi_reduction <add>, %16, %cst_10 [1] : vector<8x8xf32> to vector<8xf32>
      %18 = vector.shape_cast %17 : vector<8xf32> to vector<8x1xf32>
      %cst_11 = arith.constant dense<0.000000e+00> : vector<8xf32>
      %19 = vector.multi_reduction <add>, %16, %cst_11 [0] : vector<8x8xf32> to vector<8xf32>
      %20 = vector.shape_cast %19 : vector<8xf32> to vector<1x8xf32>
      %21 = vector.broadcast %18 : vector<8x1xf32> to vector<8x8xf32>
      %22 = vector.broadcast %20 : vector<1x8xf32> to vector<8x8xf32>
      %23 = arith.addf %21, %22 : vector<8x8xf32>
      %cst_12 = arith.constant 2.000000e+00 : f32
      %24 = vector.broadcast %cst_12 : f32 to vector<8x8xf32>
      %25 = arith.mulf %24, %11 : vector<8x8xf32>
      %26 = arith.subf %23, %25 : vector<8x8xf32>
      %cst_13 = arith.constant 3.906250e-03 : f32
      %27 = vector.broadcast %cst_13 : f32 to vector<8x8xf32>
      %28 = arith.mulf %26, %27 : vector<8x8xf32>
      %cst_14 = arith.constant 0.000000e+00 : f32
      %29 = vector.broadcast %cst_14 : f32 to vector<8x8xf32>
      %30 = arith.maximumf %28, %29 : vector<8x8xf32>
      %c0_15 = arith.constant 0 : index
      %c0_16 = arith.constant 0 : index
      %31 = vector.load %arg3[%c0_15, %c0_16] : memref<8x1xi32, #tpu.memory_space<vmem>>, vector<8x1xi32>
      %c0_17 = arith.constant 0 : index
      %c0_18 = arith.constant 0 : index
      %32 = vector.load %arg2[%c0_17, %c0_18] : memref<1x8xi32, #tpu.memory_space<vmem>>, vector<1x8xi32>
      %33 = vector.broadcast %31 : vector<8x1xi32> to vector<8x8xi32>
      %34 = vector.broadcast %32 : vector<1x8xi32> to vector<8x8xi32>
      %35 = arith.cmpi eq, %33, %34 : vector<8x8xi32>
      %cst_19 = arith.constant 1.000000e+00 : f32
      %36 = vector.broadcast %cst_19 : f32 to vector<8x8xf32>
      %37 = arith.subf %36, %30 : vector<8x8xf32>
      %cst_20 = arith.constant 0.000000e+00 : f32
      %38 = vector.broadcast %cst_20 : f32 to vector<8x8xf32>
      %39 = arith.maximumf %37, %38 : vector<8x8xf32>
      %40 = arith.select %35, %30, %39 : vector<8x8xi1>, vector<8x8xf32>
      %41 = arith.cmpi sgt, %13, %12 : vector<8x8xi32>
      %cst_21 = arith.constant 0.000000e+00 : f32
      %42 = vector.broadcast %cst_21 : f32 to vector<8x8xf32>
      %43 = arith.select %41, %40, %42 : vector<8x8xi1>, vector<8x8xf32>
      %44 = vector.shape_cast %43 : vector<8x8xf32> to vector<1x8x8xf32>
      %cst_22 = arith.constant dense<0.000000e+00> : vector<1xf32>
      %45 = vector.multi_reduction <add>, %44, %cst_22 [1, 2] : vector<1x8x8xf32> to vector<1xf32>
      %46 = vector.shape_cast %45 : vector<1xf32> to vector<1x1x1xf32>
      %47 = vector.extract %46[0, 0, 0] : f32 from vector<1x1x1xf32>
      %cst_23 = arith.constant 0.0357142873 : f32
      %48 = arith.mulf %47, %cst_23 : f32
      %c0_24 = arith.constant 0 : index
      %c0_25 = arith.constant 0 : index
      %49 = memref.load %arg4[%c0_24, %c0_25] : memref<1x1xf32, #tpu.memory_space<smem>>
      memref.store %48, %arg4[%c0_24, %c0_25] : memref<1x1xf32, #tpu.memory_space<smem>>
    } else {
    }
    return
  }
  func.func @transform_0(%arg0: i32) -> (i32, i32) {
    %c0_i32 = arith.constant 0 : i32
    %c0_i32_0 = arith.constant 0 : i32
    return %c0_i32, %arg0 : i32, i32
  }
  func.func @transform_1(%arg0: i32) -> (i32, i32) {
    %c0_i32 = arith.constant 0 : i32
    %c0_i32_0 = arith.constant 0 : i32
    %c0_i32_1 = arith.constant 0 : i32
    return %c0_i32, %c0_i32_0 : i32, i32
  }
  func.func @transform_2(%arg0: i32) -> (i32, i32) {
    %c0_i32 = arith.constant 0 : i32
    %c0_i32_0 = arith.constant 0 : i32
    %c0_i32_1 = arith.constant 0 : i32
    return %c0_i32, %c0_i32_0 : i32, i32
  }
  func.func @transform_3(%arg0: i32) -> (i32, i32) {
    %c0_i32 = arith.constant 0 : i32
    %c0_i32_0 = arith.constant 0 : i32
    %c0_i32_1 = arith.constant 0 : i32
    return %c0_i32, %c0_i32_0 : i32, i32
  }
}

</mosaic_0001>

<bundles_post_ra>
// kernel: tpu_custom_call.1
= control target key start
LH: loop header
LB: loop body
LE: loop exit
PB: predicated region body
PF: predicated region fallthrough
CT: control target
= control target key end

     0   :  { %8 = vsyncpa [#allocation4], 0  ;;  %s658_s0 = inlined_call_operand.hbm [shape: f32[8,1024], index: 0, kind: input, shape index: {}]   ;;  %s659_s1 = inlined_call_operand.vmem [shape: s32[1,8], index: 1, kind: input, shape index: {}]   ;;  %s660_s2 = inlined_call_operand.vmem [shape: s32[8,1], index: 2, kind: input, shape index: {}]   ;;  %s661_s3 = inlined_call_operand.hbm [shape: f32[1,1], index: 3, kind: output, shape index: {}]  }
   0x1   :  { %10 = vsyncpa [#allocation4 + $0x1], 0 }
   0x2   :  { %11 = vsyncpa [#allocation5], 0  ;;  %s554_s12 = smov 0   ;;  %s556_s13 = smov 0  }
   0x3   :  { %s558_s14 = smov 0   ;;  %s560_s15 = smov 0  }
   0x4 LB: > { %s573_s16 = sadd.s32 4294967295, %s529_s15   ;;  %s576_s17 = sadd.s32 1, %s529_s15   ;;  %s529_s15 = sphi %s560_s15, %s668_s15   ;;  %s525_s14 = sphi %s558_s14, %s667_s14   ;;  %s521_s13 = sphi %s556_s13, %s666_s13   ;;  %s517_s12 = sphi %s554_s12, %s665_s12  }
   0x5   : > { %s21_s18 = ssub.s32 %s529_s15, %s576_s17  ;;  %s24_s19 = sadd.s32 1, %s525_s14 }
   0x6   : > { %p22_p0 = scmp.eq.s32.totalorder %s21_s18, 0  ;;  %p31_p1 = scmp.ne.s32.totalorder %s525_s14, %s521_s13 }
   0x7   : > { %p32_p2 = scmp.eq.s32.totalorder %s529_s15, 0  ;;  %p37_p3 = scmp.ne.s32.totalorder %s521_s13, %s517_s12 }
   0x8   : > { %s586_s20 = scalar_select %p22_p0, %s525_s14, %s24_s19  }
   0x9   : > { %p588_p4 = por %p32_p2, %p31_p1  ;;  %p38_p5 = scmp.eq.s32.totalorder %s573_s16, 0 }
   0xa   : > { %p407_p6 = scmp.lt.s32.totalorder %s529_s15, 2  ;;  %s130_s23 = sand.u32 1, %s525_s14  }
   0xb   : > { %p594_p7 = por %p38_p5, %p37_p3  ;;  %s383_s24 = sshll.u32 %s130_s23, 5 }
   0xc   : > { %s394_s25 = sshll.u32 %s529_s15, 5  ;;  %s134_s29 = scalar_lea.vmem [#allocation3], %s383_s24 }
   0xd   : > { %s139_s28 = scalar_lea.hbm %s658_s0, %s394_s25  ;;  %s143_s30 = sshll.u32 %s134_s29, 4  ;;  %s144_s30 = int_to_ptr.vmem [resolvable:$true] %s143_s30 }
   0xe   : > { %s141_s4 = sshll.u32 %s139_s28, 4  ;;  %p605_p8 = pnand %p407_p6, %p588_p4  ;;  %s142_s4 = int_to_ptr.hbm [resolvable:$true] %s141_s4 }
   0xf   : > { %p386_p9 = scmp.ge.s32.totalorder %s529_s15, 1  ;;  %p148_p10 = scmp.lt.s32.totalorder %s529_s15, 3 }
  0x10   : > { %s131_s6 = scalar_lea.sflag [#allocation4], %s130_s23  ;;  %s447_s7 = sshra.s32 %s142_s4, 4  ;;  %s448_s7 = int_to_ptr.hbm [resolvable:$true] %s447_s7 }
  0x11   : > { %s449_s8 = scalar_lea.hbm %s448_s7, 32  ;;  %p451_p12 = pneg %p605_p8 }
  0x12   : > { %p450_p11 = scmp.ne.s32.totalorder %s448_s7, %s449_s8  ;;  %s454_s11 = scalar_lea.hbm %s658_s0, 64 }
  0x13   : > { %p455_p1 = scmp.lt.s32.totalorder %s448_s7, %s658_s0  ;;  %p456_p2 = scmp.lt.s32.totalorder %s454_s11, %s449_s8 }
  0x14   : > { %p452_p13 = pnand %p451_p12, %p450_p11 }
  0x15   : > { %p457_p3 = por %p456_p2, %p455_p1 }
  0x16   : > { %p453_p0 = pneg %p452_p13 }
  0x18   : > { %p458_p4 = pnand %p457_p3, %p453_p0 }
  0x1a   : > { %461 = shalt.err (!%p458_p4)
}
  0x1b   : > { %406 = dma.hbm_to_vmem [thread:$0]  (!%p605_p8), %s142_s4, 512, %s144_s30, %s131_s6  }
  0x1c   : > { %p149_p5 = pnand %p386_p9, %p148_p10 }
  0x1d   : > { %s154_s19 = sand.u32 (!%p149_p5), 1, %s521_s13  }
  0x1e   : > { %152 = sbr.rel (%p149_p5) target bundleno = 523 (0x20b), region = 32  ;;  %s387_s21 = sshll.u32 (!%p149_p5), %s154_s19, 5 }
  0x1f   : > { %s155_s23 = scalar_lea.sflag (!%p149_p5), [#allocation4], %s154_s19  ;;  %s158_s24 = scalar_lea.vmem (!%p149_p5), [#allocation3], %s387_s21 }
  0x23   : > { %508 = dma.done.wait (%p594_p7), %s155_s23, 512  }
  0x24   : > { %510 = vsyncadd (%p594_p7), %s155_s23, 4294966784  ;;  %p388_p6 = scmp.ne.s32.totalorder %s573_s16, 0 }
  0x26   : > { %181 = sbr.rel (%p388_p6) target bundleno = 45 (0x2d), region = 40 }
  0x2b   : > { %vm182_vm0 = vcmask 64512   ;;  %v531_v0 = vmov 0.0  }
  0x2c   : > { %183 = vst.msk [vmem:[#allocation2] sm:$0xff] %vm182_vm0, %v531_v0 }
  0x2d PF: > { %v186_v1 = vld [vmem:[%s158_s24 + $0x10] sm:$0xff]  ;;  %v187_v2 = vld [vmem:[%s158_s24 + $0x18] sm:$0xff]  ;;  %v184_v3 = vld [vmem:[%s158_s24] sm:$0xff]  ;;  %vm270_vm1 = vcmask 64512   ;;  %p389_p7 = scmp.ne.s32.totalorder %s573_s16, 1 }
  0x2e   : > { %244 = vmatpush.xpose.msra.mxu2 %v186_v1  ;;  %264 = vmatpush.xpose.msra.mxu3 %v187_v2  ;;  %v185_v4 = vld [vmem:[%s158_s24 + $0x8] sm:$0xff] }
  0x2f   : > { %204 = vmatpush.xpose.msra.mxu0 %v184_v3  ;;  %224 = vmatpush.xpose.msra.mxu1 %v185_v4 }
  0x31   : > { %245 = vmatmul.f32.vlgmr.msra.gmra.mxu2 %v186_v1  ;;  %265 = vmatmul.f32.vlgmr.msra.gmra.mxu3 %v187_v2 }
  0x32   : > { %205 = vmatmul.f32.vlgmr.msra.gmra.mxu0 %v184_v3  ;;  %225 = vmatmul.f32.vlgmr.msra.gmra.mxu1 %v185_v4 }
  0x33   : > { %v188_v11 = vld [vmem:[#allocation2] sm:$0xff] }
  0xaf   : > { %v206_v5 = vpop.f32.mrf.mxu0  ;;  %v226_v6 = vpop.f32.mrf.mxu1 }
  0xb0   : > { %v227_v7 = vadd.f32 %v226_v6, %v206_v5 }
  0xb4   : > { %v246_v8 = vpop.f32.mrf.mxu2  ;;  %v266_v9 = vpop.f32.mrf.mxu3 }
  0xb5   : > { %v247_v10 = vadd.f32 %v246_v8, %v227_v7 }
  0xb7   : > { %v267_v12 = vadd.f32 %v266_v9, %v247_v10  ;;  %275 = sbr.rel (%p389_p7) target bundleno = 517 (0x205), region = 44 }
  0xb9   : > { %v269_v13 = vadd.f32 %v267_v12, %v188_v11 }
  0xbb   : > { %271 = vst.msk [vmem:[#allocation2] sm:$0xff] %vm270_vm1, %v269_v13 }
  0xbc   : > { %v277_v14 = vlaneseq  ;;  %v532_v15 = vmov 0   ;;  %v297_v21 = vld [vmem:[%s660_s2] sm:$0xff] }
  0xbd   : > { %445 = vset.pattern.permute.xlu0 %v532_v15  ;;  %v446_v35 = vld [vmem:[%s659_s1] ss:$0 sm:$0xff] }
  0xbe   : > { %v278_v17 = vshrl.u32 %v277_v14, 7  ;;  %v280_v18 = vand.u32 127, %v277_v14 }
  0xc0   : > { %vm281_vm2 = vcmp.eq.s32.totalorder %v278_v17, %v280_v18  ;;  %vm307_vm3 = vcmp.gt.s32.totalorder %v280_v18, %v278_v17 }
  0xc2   : > { %v276_v16 = vld [vmem:[#allocation2] sm:$0xff] }
  0xc3   : > { %v282_v19 = vsel %vm281_vm2, %v276_v16, 0.0  ;;  %v293_v28 = vmul.f32 2.0, %v276_v16 }
  0xc4   : > { %v283_v20 = vsel %vm270_vm1, %v282_v19, 0.0 }
  0xc5   : > { %284 = vadd.xlane.f32.xlu0 %v283_v20  ;;  %v286_v22 = vrot.slane %v283_v20, 4 }
  0xc7   : > { %v287_v23 = vadd.f32 %v286_v22, %v283_v20 }
  0xc9   : > { %v288_v24 = vrot.slane %v287_v23, 2 }
  0xcb   : > { %v289_v25 = vadd.f32 %v288_v24, %v287_v23 }
  0xcd   : > { %v290_v26 = vrot.slane %v289_v25, 1 }
  0xcf   : > { %v291_v27 = vadd.f32 %v290_v26, %v289_v25 }
  0xd9   : > { %300 = vperm.xlu0 %445, %v297_v21  }
 0x138   : > { %v285_v29 = vpop.xlane.xlu0 %284 }
 0x139   : > { %v292_v30 = vadd.f32 %v291_v27, %v285_v29 }
 0x13b   : > { %v294_v31 = vsub.f32 %v292_v30, %v293_v28 }
 0x13d   : > { %v295_v32 = vmul.f32 0.00390625, %v294_v31 }
 0x13f   : > { %v296_v33 = vmax.f32 %v295_v32, 0.0 }
 0x141   : > { %v304_v34 = vsub.f32 1.0, %v296_v33 }
 0x143   : > { %v305_v37 = vmax.f32 %v304_v34, 0.0 }
 0x14b   : > { %v301_v36 = vpop.permute.xlu0 %300 }
 0x14c   : > { %vm303_vm4 = vcmp.eq.s32.totalorder %v301_v36, %v446_v35 }
 0x14d   : > { %v306_v38 = vsel %vm303_vm4, %v296_v33, %v305_v37 }
 0x14e   : > { %v308_v39 = vsel %vm307_vm3, %v306_v38, 0.0 }
 0x14f   : > { %v309_v40 = vsel %vm270_vm1, %v308_v39, 0.0 }
 0x150   : > { %310 = vadd.xlane.f32.xlu1 %v309_v40 }
 0x1c3   : > { %v311_v41 = vpop.xlane.xlu1 %310 }
 0x1c4   : > { %v312_v42 = vrot.slane %v311_v41, 4 }
 0x1c6   : > { %v313_v43 = vadd.f32 %v312_v42, %v311_v41 }
 0x1c8   : > { %v314_v44 = vrot.slane %v313_v43, 2 }
 0x1ca   : > { %v315_v45 = vadd.f32 %v314_v44, %v313_v43 }
 0x1cc   : > { %v316_v46 = vrot.slane %v315_v45, 1 }
 0x1ce   : > { %v317_v47 = vadd.f32 %v316_v46, %v315_v45 }
 0x1d0   : > { %395 = vpush %v317_v47 }
 0x201   : > { %s396_s27 = spop %395 }
 0x202   : > { %s319_s28 = smul.f32 0.035714287, %s396_s27 }
 0x204   : > { %321 = sst [smem:[#allocation6]] %s319_s28 }
 0x205 PF: > { %p408_p8 = scmp.eq.s32.totalorder %s573_s16, 1  ;;  %s328_s4 = sshll.u32 %s661_s3, 4  ;;  %s329_s4 = int_to_ptr.hbm [resolvable:$true] %s328_s4 }
 0x206   : > { %s533_s5 = smov [#allocation6]  }
 0x207   : > { %400 = dma.smem_to_hbm (%p408_p8), %s533_s5, 16, %s329_s4, [#allocation5]  }
 0x208   : > { %512 = dma.done.wait (%p408_p8), [#allocation5], 16  }
 0x209   : > { %514 = vsyncadd (%p408_p8), [#allocation5], 4294967280 }
 0x20a   : > { %337 = sfence }
 0x20b PF: > { %p14_p9 = scmp.ge.s32.totalorder %s576_s17, 4   ;;  %s665_s12 = smov %s521_s13 }
 0x20c   : > { %s666_s13 = smov %s525_s14  ;;  %s667_s14 = smov %s586_s20 }
 0x20d   : > { %s668_s15 = smov %s576_s17  ;;  %16 = sbr.rel (!%p14_p9) target bundleno = 4 (0x4), region = 78 }
 0x212   :  { %343 = vsyncpa [#allocation4], 1 }
 0x213   :  { %345 = vsyncpa [#allocation4 + $0x1], 1 }
 0x214   :  { %346 = vsyncpa [#allocation5], 1 }
 0x215   :  { %348 = vsyncpa [#allocation5 + $0x1], 1 }

</bundles_post_ra>
